<compile_context>
chip_gen: v5e
topology: v5e:2x2
jax: 0.10.0
libtpu: 0.0.40
codegen_flags: <defaults>
</compile_context>

<pallas_src>
import functools
import math

import jax
import jax.numpy as jnp
from jax.experimental import pallas as pl
from jax.experimental.pallas import tpu as pltpu


def _round_up(v, m):
    return ((v + m - 1) // m) * m


# ----------------------------------------------------------------------------
# Gaussian smearing (tiny EUP kernel, cached per num_bins)
# ----------------------------------------------------------------------------
def _gaussian_smearing_kernel(dist_ref, offset_ref, out_ref, *, coeff):
    # dist_ref: (1, num_bins), offset_ref: (ng, 1) -> out: (ng, num_bins)
    d = dist_ref[...] - offset_ref[...]
    out_ref[...] = jnp.exp(coeff * d * d)


def gaussian_smearing(num_bins, offset, coeff):
    """exp(coeff * (dist[n] - offset[g])**2) -> (num_bins, num_gaussians)."""
    ng = offset.shape[0]
    dist = jnp.linspace(0.0, 1.0, num_bins).reshape(1, num_bins).astype(jnp.float32)
    off = offset.reshape(ng, 1).astype(jnp.float32)
    out_gn = pl.pallas_call(
        functools.partial(_gaussian_smearing_kernel, coeff=float(coeff)),
        out_shape=jax.ShapeDtypeStruct((ng, num_bins), jnp.float32),
    )(dist, off)
    return out_gn.T                                    # (num_bins, ng)


# ----------------------------------------------------------------------------
# Conv1d + bias + ReLU layer kernel
# ----------------------------------------------------------------------------
def _conv1d_relu_kernel(x_ref, w_ref, b_ref, o_ref, s_ref, *,
                        ntap, tl, l_out, mask_tail):
    # x_ref: (rows2d, width) bf16   per-batch input block, resident across L tiles
    # w_ref: (ntap*width, C_out) bf16   resident across the whole grid
    # b_ref: (1, C_out) f32
    # o_ref: (tl, C_out) bf16   channels-last activation carried to the next layer
    # s_ref: (C_out, tl) f32    user-visible NCL sample
    o0 = pl.multiple_of(pl.program_id(1) * tl, 8)      # output-row offset of tile

    # ntap contiguous row-shifted views; single lane-concat; single MXU dot.
    slabs = [x_ref[pl.ds(o0 + t, tl), :] for t in range(ntap)]
    xcat = slabs[0] if ntap == 1 else jnp.concatenate(slabs, axis=-1)
    y = jnp.dot(xcat, w_ref[...], preferred_element_type=jnp.float32)
    y = jnp.maximum(y + b_ref[...], 0.0)

    if mask_tail:
        # Zero the padded tail rows so the activation can be carried forward
        # (next layer treats them as conv zero-padding) without a slicing copy.
        rows = o0 + jax.lax.broadcasted_iota(jnp.int32, (tl, 1), 0)
        y = jnp.where(rows < l_out, y, 0.0)

    o_ref[...] = y.astype(o_ref.dtype)                 # bf16 BLC activation
    s_ref[...] = jnp.transpose(y)                      # f32 NCL sample


@functools.lru_cache(maxsize=1)
def _vmem_cap_bytes():
    cap = 64 << 20                                     # conservative (v7x per-TC)
    try:
        info = pltpu.get_tpu_info()
        cap = int(getattr(info, "vmem_capacity_bytes", cap))
    except Exception:
        pass
    return max(16 << 20, int(cap * 0.72))              # ~92 MiB v5e/v6e, ~46 MiB v7x


def _tile_bytes(rows, cols, itemsize):
    sub = max(1, 32 // itemsize)                       # f32 -> 8 rows, bf16 -> 16
    return _round_up(max(rows, 1), sub) * _round_up(max(cols, 1), 128) * itemsize


def _pick_vmem_limit(rows2d, width, ntap, tl, c_out):
    est = (2 * _tile_bytes(rows2d, width, 2)           # resident x block (dbl-buffered)
           + 2 * _tile_bytes(ntap * width, c_out, 2)   # weights
           + 2 * _tile_bytes(1, c_out, 4)              # bias
           + 2 * _tile_bytes(tl, c_out, 2)             # BLC output tile
           + 2 * _tile_bytes(c_out, tl, 4)             # NCL sample tile
           + 2 * _tile_bytes(tl, ntap * width, 2)      # xcat temporary
           + _tile_bytes(tl, c_out, 4)                 # f32 accumulator
           + (4 << 20))                                # headroom
    return int(min(max(est, 16 << 20), _vmem_cap_bytes()))


_MAX_TL = 1024   # output-row tile: multiple of 128 when tiled, else == l_out_pad


def conv1d_relu_blc(x, l_true, w_flat, b_row, *, stride, padding, ksize):
    """ReLU(Conv1d(x)) on a channels-last (B, L, C) bf16 activation.

    x:       (B, l_store, C_in) bf16, l_store >= l_true, rows beyond l_true are 0.
    l_true:  true (unpadded) input length.
    w_flat:  (ntap*width, C_out) bf16 (see DownBlocksPallas.__init__).
    b_row:   (1, C_out) f32.
    Returns (act_blc (B, l_out_pad, C_out) bf16 with zeroed tail rows,
             sample_ncl (B, C_out, l_out_pad) f32,
             l_out)
    """
    B, l_store, c_in = x.shape
    c_out = w_flat.shape[1]
    l_out = (l_true + 2 * padding - ksize) // stride + 1
    assert l_out >= 1, "output length must be positive"

    tl = min(_MAX_TL, _round_up(l_out, 8))
    n_lt = -(-l_out // tl)
    l_out_pad = n_lt * tl

    if stride == 1:
        ntap = ksize
        rows_needed = l_out_pad + ntap - 1
        lp = max(rows_needed, padding + l_store)
        x2d = jnp.pad(x, ((0, 0), (padding, lp - padding - l_store), (0, 0)))
    else:
        ntap = -(-ksize // stride)
        rows_needed = l_out_pad + ntap - 1
        lp = max(rows_needed * stride, _round_up(padding + l_store, stride))
        xp = jnp.pad(x, ((0, 0), (padding, lp - padding - l_store), (0, 0)))
        # Free row-major regroup: row j now holds original rows j*s .. j*s+s-1,
        # so every tap becomes a contiguous (non-strided) sublane read.
        x2d = xp.reshape(B, lp // stride, stride * c_in)
    rows2d, width = x2d.shape[1], x2d.shape[2]
    assert w_flat.shape[0] == ntap * width

    kern = functools.partial(_conv1d_relu_kernel, ntap=ntap, tl=tl,
                             l_out=l_out, mask_tail=(l_out != l_out_pad))

    cost = pl.CostEstimate(
        flops=2 * B * l_out_pad * ntap * width * c_out,
        transcendentals=0,
        bytes_accessed=(x2d.size * 2 + w_flat.size * 2 + b_row.size * 4
                        + B * l_out_pad * c_out * (2 + 4)))

    act, sample = pl.pallas_call(
        kern,
        out_shape=(jax.ShapeDtypeStruct((B, l_out_pad, c_out), jnp.bfloat16),
                   jax.ShapeDtypeStruct((B, c_out, l_out_pad), jnp.float32)),
        grid=(B, n_lt),
        in_specs=[
            pl.BlockSpec((None, rows2d, width), lambda b, l: (b, 0, 0)),
            pl.BlockSpec((ntap * width, c_out), lambda b, l: (0, 0)),
            pl.BlockSpec((1, c_out), lambda b, l: (0, 0)),
        ],
        out_specs=(
            pl.BlockSpec((None, tl, c_out), lambda b, l: (b, l, 0)),
            pl.BlockSpec((None, c_out, tl), lambda b, l: (b, 0, l)),
        ),
        compiler_params=pltpu.CompilerParams(
            dimension_semantics=("parallel", "parallel"),
            vmem_limit_bytes=_pick_vmem_limit(rows2d, width, ntap, tl, c_out)),
        cost_estimate=cost,
    )(x2d, w_flat, b_row)

    return act, sample, l_out


# ----------------------------------------------------------------------------
# DownBlocks (parameter container + forward)
# ----------------------------------------------------------------------------
class DownBlocksPallas:
    def __init__(self, in_size, hidden_sizes, output_size, kernel_sizes,
                 strides, paddings, num_gaussians=6, return_samples=True,
                 key=jax.random.PRNGKey(0)):
        del output_size  # unused in the reference module's forward
        self.num_gaussians = num_gaussians
        self.return_samples = return_samples

        # GaussianSmearing(start=0, stop=1, num_gaussians)
        self.offset = jnp.linspace(0.0, 1.0, num_gaussians)
        step = 1.0 / (num_gaussians - 1)
        self.coeff = -0.5 / step ** 2
        self._smear_cache = {}

        sizes = [in_size + num_gaussians, *hidden_sizes]
        self.in_channels = sizes[0]

        self.layers = []
        for i in range(len(sizes) - 1):
            c_in, c_out, k = sizes[i], sizes[i + 1], kernel_sizes[i]
            s = strides[i]
            key, kw, kb = jax.random.split(key, 3)
            bound = 1.0 / math.sqrt(c_in * k)   # PyTorch Conv1d default init
            w = jax.random.uniform(kw, (c_out, c_in, k), jnp.float32, -bound, bound)
            b = jax.random.uniform(kb, (c_out,), jnp.float32, -bound, bound)

            # Flattened weight matching the kernel's lane-concatenated views:
            #   stride == 1: rows ordered (tap k, channel i)
            #   stride  > 1: taps zero-padded to ntap*stride, rows ordered
            #                (row-group r, in-group phase p, channel i)
            w_kio = jnp.transpose(w, (2, 1, 0))                 # (K, C_in, C_out)
            if s > 1:
                ntap = -(-k // s)
                w_kio = jnp.pad(w_kio, ((0, ntap * s - k), (0, 0), (0, 0)))
            w_flat = w_kio.reshape(-1, c_out).astype(jnp.bfloat16)
            b_row = b.reshape(1, c_out).astype(jnp.float32)

            self.layers.append(dict(
                w=w, b=b, w_flat=w_flat, b_row=b_row,
                stride=s, padding=paddings[i], ksize=k,
                c_in=c_in, c_out=c_out))

    def _smear(self, num_bins):
        # Precomputed once per num_bins (hoisted out of the hot path).
        if num_bins not in self._smear_cache:
            self._smear_cache[num_bins] = gaussian_smearing(
                num_bins, self.offset, self.coeff)              # (num_bins, ng)
        return self._smear_cache[num_bins]

    def __call__(self, x):
        B = x.shape[0]
        num_bins = x.shape[-1]
        if x.ndim == 2:
            x_ncl = x[:, None, :].astype(jnp.float32)           # (B, 1, N)
        elif x.ndim == 3:
            x_ncl = x.astype(jnp.float32)                       # (B, C, N)
        else:
            raise Exception(f"unknown!! {x.shape}")
        c_total = x_ncl.shape[1] + self.num_gaussians
        assert c_total == self.in_channels, "input channels do not match in_size"

        smear = self._smear(num_bins)                           # (N, ng) f32
        smear_ncl = jnp.broadcast_to(jnp.transpose(smear)[None, :, :],
                                     (B, self.num_gaussians, num_bins))
        # User-visible informed_x (true size, no channel padding).
        informed_ncl = jnp.concatenate([x_ncl, smear_ncl], axis=1)   # (B, C+ng, N)

        # Kernel-side activation: channels-last, TRUE channel count, bf16.
        h = jnp.transpose(informed_ncl, (0, 2, 1)).astype(jnp.bfloat16)
        l_true = num_bins

        samples = [informed_ncl]
        last = informed_ncl
        for layer in self.layers:
            h, s_ncl, l_true = conv1d_relu_blc(
                h, l_true, layer["w_flat"], layer["b_row"],
                stride=layer["stride"], padding=layer["padding"],
                ksize=layer["ksize"])
            s = s_ncl if s_ncl.shape[-1] == l_true else s_ncl[:, :, :l_true]
            if self.return_samples:
                samples.append(s)
            last = s

        return samples if self.return_samples else last


# ----------------------------------------------------------------------------
# Pure-JAX reference (same math: bf16 MXU operands, f32 accumulation)
# ----------------------------------------------------------------------------
def _ref_conv1d_relu(x, w, b, stride, padding):
    out = jax.lax.conv_general_dilated(
        x.astype(jnp.bfloat16), w.astype(jnp.bfloat16),
        window_strides=(stride,), padding=[(padding, padding)],
        dimension_numbers=("NCH", "OIH", "NCH"),
        preferred_element_type=jnp.float32)
    return jnp.maximum(out + b[None, :, None].astype(jnp.float32), 0.0)


if __name__ == "__main__":
    key = jax.random.PRNGKey(0)
    k_x, k_params = jax.random.split(key)

    # Small shapes consistent with the module: 3-D input (batch, channels, bins)
    B, C, N = 2, 4, 16
    x = jax.random.normal(k_x, (B, C, N), dtype=jnp.float32)

    model = DownBlocksPallas(
        in_size=C,
        hidden_sizes=[8, 16],
        output_size=16,
        kernel_sizes=[3, 3],
        strides=[2, 2],
        paddings=[1, 1],
        num_gaussians=6,
        return_samples=True,
        key=k_params,
    )

    outs = model(x)
    outs = jax.block_until_ready(outs)

    # --- silent correctness checks against pure-JAX references ---
    # informed_x (replicates the PyTorch permute/broadcast/concat dance)
    dist = jnp.linspace(0.0, 1.0, N)
    smear_ref = jnp.exp(model.coeff * (dist[:, None] - model.offset[None, :]) ** 2)
    informed_ref = jnp.concatenate(
        [x, jnp.broadcast_to(smear_ref.T[None, :, :], (B, model.num_gaussians, N))],
        axis=1)                                                  # (B, C+ng, N)
    assert outs[0].shape == (B, C + model.num_gaussians, N)
    assert jnp.allclose(outs[0], informed_ref, atol=1e-5, rtol=1e-5), "informed mismatch"

    # Each layer checked in isolation: the module carries bf16(prev f32 output),
    # which is exactly bf16(outs[i]) since samples are the f32 pre-cast values.
    for i, layer in enumerate(model.layers):
        ref = _ref_conv1d_relu(outs[i], layer["w"], layer["b"],
                               layer["stride"], layer["padding"])
        assert outs[i + 1].shape == ref.shape, f"shape mismatch at layer {i}"
        assert jnp.allclose(outs[i + 1], ref, atol=2e-3, rtol=2e-3), \
            f"mismatch at layer {i}"

    print("KERNEL_OK")
</pallas_src>

<mosaic_0001>
module attributes {stable_mosaic.version = 11 : i64} {
  func.func @_gaussian_smearing_kernel(%arg0: memref<1x16xf32, #tpu.memory_space<vmem>>, %arg1: memref<6x1xf32, #tpu.memory_space<vmem>>, %arg2: memref<6x16xf32, #tpu.memory_space<vmem>>) attributes {dimension_semantics = [], scalar_prefetch = 0 : i64, scratch_operands = 0 : i64, tpu.core_type = #tpu.core_type<tc>} {
    %c0 = arith.constant 0 : index
    %c0_0 = arith.constant 0 : index
    %0 = vector.load %arg0[%c0, %c0_0] : memref<1x16xf32, #tpu.memory_space<vmem>>, vector<1x16xf32>
    %c0_1 = arith.constant 0 : index
    %c0_2 = arith.constant 0 : index
    %1 = vector.load %arg1[%c0_1, %c0_2] : memref<6x1xf32, #tpu.memory_space<vmem>>, vector<6x1xf32>
    %2 = vector.broadcast %0 : vector<1x16xf32> to vector<6x16xf32>
    %3 = vector.broadcast %1 : vector<6x1xf32> to vector<6x16xf32>
    %4 = arith.subf %2, %3 : vector<6x16xf32>
    %cst = arith.constant -1.250000e+01 : f32
    %5 = vector.broadcast %cst : f32 to vector<6x16xf32>
    %6 = arith.mulf %5, %4 : vector<6x16xf32>
    %7 = arith.mulf %6, %4 : vector<6x16xf32>
    %8 = math.exp %7 : vector<6x16xf32>
    %c0_3 = arith.constant 0 : index
    %c0_4 = arith.constant 0 : index
    %9 = vector.load %arg2[%c0_3, %c0_4] : memref<6x16xf32, #tpu.memory_space<vmem>>, vector<6x16xf32>
    tpu.vector_store %arg2[%c0_3, %c0_4], %8 {strides = array<i32>} : memref<6x16xf32, #tpu.memory_space<vmem>>, vector<6x16xf32>,
    return
  }
}

</mosaic_0001>

<bundles_post_ra>
// kernel: tpu_custom_call.1
= control target key start
LH: loop header
LB: loop body
LE: loop exit
PB: predicated region body
PF: predicated region fallthrough
CT: control target
= control target key end

     0   :  { %v77_v1 = vmov 0   ;;  %s103_s0 = inlined_call_operand.vmem [shape: f32[1,16], index: 0, kind: input, shape index: {}]   ;;  %s104_s1 = inlined_call_operand.vmem [shape: f32[6,1], index: 1, kind: input, shape index: {}]   ;;  %s105_s2 = inlined_call_operand.hbm [shape: f32[6,16], index: 2, kind: output, shape index: {}]  }
   0x1   :  { %v13_v0 = vld [vmem:[%s104_s1] sm:$0x3f]  ;;  %47 = vset.pattern.permute.xlu0 %v77_v1 }
   0x2   :  { %7 = vsyncpa [#allocation3], 0  ;;  %19 = vperm.xlu0 %47, %v13_v0   ;;  %v48_v2 = vld [vmem:[%s103_s0] ss:$0 sm:$0xff]  ;;  %s78_s13 = smov [#allocation2]   ;;  %s36_s1 = sshll.u32 %s105_s2, 4  ;;  %s37_s1 = int_to_ptr.hbm [resolvable:$true] %s36_s1 }
   0x3   :  { %s34_s14 = sshll.u32 %s78_s13, 4  ;;  %vm27_vm0 = vcmask 128000   ;;  %s35_s14 = int_to_ptr.vmem [resolvable:$true] %s34_s14 }
  0x74   :  { %v20_v3 = vpop.permute.xlu0 %19 }
  0x75   :  { %v22_v4 = vsub.f32 %v48_v2, %v20_v3 }
  0x77   :  { %v23_v5 = vmul.f32 -12.5, %v22_v4 }
  0x79   :  { %v24_v6 = vmul.f32 %v23_v5, %v22_v4 }
  0x7b   :  { %v25_v7 = vmul.f32 1.442695, %v24_v6 }
  0x7d   :  { %49 = vpow2.f32 %v25_v7 }
  0x83   :  { %v50_v8 = vpop.eup %49 }
  0x84   :  { %28 = vst.msk [vmem:[#allocation2] sm:$0x3f] %vm27_vm0, %v50_v8 }
  0x85   :  { %39 = dma.vmem_to_hbm [thread:$0]  %s35_s14, 128, %s37_s1, [#allocation3]  }
  0x86   :  { %75 = dma.done.wait [#allocation3], 128  }
  0x87   :  { %76 = vsyncadd [#allocation3], 4294967168 }
  0x88   :  { %44 = vsyncpa [#allocation3], 1 }

</bundles_post_ra>
